<compile_context>
chip_gen: v6e
topology: v6e:2x2x1
jax: 0.10.0
libtpu: 0.0.40
codegen_flags: <defaults>
</compile_context>

<pallas_src>
import functools

import jax
import jax.numpy as jnp
from jax import lax
from jax.experimental import pallas as pl
from jax.experimental.pallas import tpu as pltpu


def lstm_fc_kernel(x_ref, w_ih_ref, w_hh_ref, b_ref, w_fc_ref, b_fc_ref,
                   out_ref, h_scr, c_scr, gates_scr,
                   *, t_blk, t_real, needs_mask, unroll):
    """One grid step processes t_blk timesteps; h/c carried in VMEM scratch.

    x_ref:     (t_blk*B, I)   f32   time-major block of the flattened sequence
    w_ih_ref:  (I, 4H)        f32   (g-gate columns pre-scaled by 2)
    w_hh_ref:  (H, 4H)        bf16  (g-gate columns pre-scaled by 2)
    b_ref:     (1, 4H)        f32   (b_ih + b_hh, g slice pre-scaled by 2)
    w_fc_ref:  (H, O)         bf16
    b_fc_ref:  (1, O)         f32
    out_ref:   (B, O)         f32   written on the last grid step only
    h_scr, c_scr: (B, H)      f32   VMEM scratch, persists across grid steps
    gates_scr: (t_blk*B, 4H)  f32   hoisted input projection for this block
    """
    tb = pl.program_id(0)
    n_tb = pl.num_programs(0)
    B, H = h_scr.shape
    I = x_ref.shape[1]

    @pl.when(tb == 0)
    def _init():
        h_scr[...] = jnp.zeros_like(h_scr)
        c_scr[...] = jnp.zeros_like(c_scr)

    # Hoisted input projection (+ combined bias) for every timestep in this block.
    if I == 1:
        # K=1 "matmul" is an outer product: exact f32 on the VPU, no MXU traffic,
        # no bf16 cast of x.
        xw = x_ref[...] * w_ih_ref[...] + b_ref[...]          # (t_blk*B, 4H) f32
    else:
        xw = jnp.dot(x_ref[...].astype(jnp.bfloat16),
                     w_ih_ref[...].astype(jnp.bfloat16),
                     preferred_element_type=jnp.float32) + b_ref[...]
    # Park in VMEM so the serial recurrence reads (B, 4H) rows instead of keeping the
    # whole block live in vregs.
    gates_scr[...] = xw

    w_hh = w_hh_ref[...]          # bf16, resident across the loop

    def step(t, carry):
        h, c = carry
        row = pl.multiple_of(t * B, B)
        gates = gates_scr[pl.ds(row, B), :] + jnp.dot(
            h.astype(jnp.bfloat16), w_hh,
            preferred_element_type=jnp.float32)               # (B, 4H) f32

        # Single full-vreg EUP pass; tanh(g) recovered via 2*sigmoid(2g) - 1
        # (g columns of the weights/bias were pre-scaled by 2).
        sig = jax.nn.sigmoid(gates)                           # [sig_i | sig_f | sig_2g | sig_o]
        # Lane-0-align f/g/o with XLU rolls so every slice is an alignment-free view.
        f_al = pltpu.roll(sig, 3 * H, axis=1)
        g_al = pltpu.roll(sig, 2 * H, axis=1)
        o_al = pltpu.roll(sig, 1 * H, axis=1)
        i_g = sig[:, :H]
        f_g = f_al[:, :H]
        g_g = 2.0 * g_al[:, :H] - 1.0                         # == tanh(g)
        o_g = o_al[:, :H]

        c_new = f_g * c + i_g * g_g
        h_new = o_g * jnp.tanh(c_new)

        if needs_mask:
            # Padded timesteps (global index >= t_real) must not advance the state so
            # the "last timestep" output matches the unpadded sequence.
            valid = (tb * t_blk + t) < t_real
            c_new = jnp.where(valid, c_new, c)
            h_new = jnp.where(valid, h_new, h)
        return h_new, c_new

    h, c = lax.fori_loop(0, t_blk, step, (h_scr[...], c_scr[...]), unroll=unroll)

    h_scr[...] = h
    c_scr[...] = c

    @pl.when(tb == n_tb - 1)
    def _finalize():
        out_ref[...] = (
            jnp.dot(h.astype(jnp.bfloat16), w_fc_ref[...],
                    preferred_element_type=jnp.float32)
            + b_fc_ref[...]
        ).astype(out_ref.dtype)


def init_params(key, input_size, hidden_size, output_size):
    """Deterministic PyTorch-style uniform(-1/sqrt(H), 1/sqrt(H)) init."""
    ks = jax.random.split(key, 6)
    bound = 1.0 / jnp.sqrt(jnp.float32(hidden_size))
    u = lambda k, shape: jax.random.uniform(
        k, shape, jnp.float32, minval=-bound, maxval=bound)
    w_ih = u(ks[0], (4 * hidden_size, input_size))   # torch weight_ih_l0
    w_hh = u(ks[1], (4 * hidden_size, hidden_size))  # torch weight_hh_l0
    b_ih = u(ks[2], (4 * hidden_size,))
    b_hh = u(ks[3], (4 * hidden_size,))
    w_fc = u(ks[4], (output_size, hidden_size))      # torch fc.weight
    b_fc = u(ks[5], (output_size,))
    return w_ih, w_hh, b_ih, b_hh, w_fc, b_fc


def prepare_params(params):
    """One-time layout / dtype / gate-scaling prep (done at init, not per call)."""
    w_ih, w_hh, b_ih, b_hh, w_fc, b_fc = params
    H = w_hh.shape[1]
    # Pre-scale the g-gate (torch rows 2H:3H) by 2 so the kernel can use
    # tanh(z) = 2*sigmoid(2z) - 1 and run a single sigmoid over the gates vreg.
    scale = jnp.ones((4 * H,), jnp.float32).at[2 * H:3 * H].set(2.0)
    w_ih_s = w_ih * scale[:, None]
    w_hh_s = w_hh * scale[:, None]
    bias_s = (b_ih + b_hh) * scale
    return (
        jnp.asarray(w_ih_s.T, jnp.float32),                 # (I, 4H)  f32 (VPU path)
        jnp.asarray(w_hh_s.T, jnp.bfloat16),                # (H, 4H)  bf16 (MXU)
        jnp.asarray(bias_s[None, :], jnp.float32),          # (1, 4H)
        jnp.asarray(w_fc.T, jnp.bfloat16),                  # (H, O)   bf16 (MXU)
        jnp.asarray(b_fc[None, :], jnp.float32),            # (1, O)
    )


@functools.partial(jax.jit, static_argnames=("t_blk",))
def lstm_model_forward(x, prepped, t_blk=64):
    """x: (B, T, I) float32, batch_first like the PyTorch module."""
    w_ih_t, w_hh_t, bias, w_fc_t, b_fc2 = prepped
    B, T, I = x.shape
    H = w_hh_t.shape[0]
    O = w_fc_t.shape[1]

    # Whole sequence in one grid step when it fits the default block (per-grid-step
    # pipeline overhead ~0.35us dominates at these sizes); otherwise pad T up to a
    # multiple of t_blk and mask the padded timesteps in-kernel.
    t_blk = max(1, min(t_blk, T))
    t_pad = pl.cdiv(T, t_blk) * t_blk
    n_tb = t_pad // t_blk
    needs_mask = (t_pad != T)
    unroll = t_blk if t_blk <= 16 else 8

    # Pad batch to the f32 sublane granule (padded rows develop nonzero h/c from the
    # bias; harmless, the output is sliced back to [:B]).
    B_pad = ((B + 7) // 8) * 8
    x_p = jnp.pad(x.astype(jnp.float32),
                  ((0, B_pad - B), (0, t_pad - T), (0, 0)))
    # batch_first (B,T,I) -> time-major, flattened (T_pad*B_pad, I): the per-block input
    # projection becomes a single broadcast-multiply / matmul with no in-kernel reshape.
    x_flat = jnp.transpose(x_p, (1, 0, 2)).reshape(t_pad * B_pad, I)

    # VMEM budget: double-buffered x block + resident (double-buffered) weights +
    # h/c/gates scratch + output.  Explicit limit keeps larger t_blk safe on v7x
    # (64 MiB physical) and within v5e's scoped default.
    vmem_bytes = (
        2 * t_blk * B_pad * I * 4
        + 2 * (I * 4 * H * 4 + H * 4 * H * 2 + 4 * H * 4 + H * O * 2 + O * 4)
        + 2 * B_pad * H * 4
        + t_blk * B_pad * 4 * H * 4
        + 2 * B_pad * O * 4)
    vmem_limit = int(min(max(2 * vmem_bytes, 8 << 20), 48 << 20))

    kernel = functools.partial(
        lstm_fc_kernel, t_blk=t_blk, t_real=T, needs_mask=needs_mask, unroll=unroll)

    grid_spec = pltpu.PrefetchScalarGridSpec(
        num_scalar_prefetch=0,
        grid=(n_tb,),
        in_specs=[
            pl.BlockSpec((t_blk * B_pad, I), lambda t: (t, 0)),   # x: streamed over T
            pl.BlockSpec((I, 4 * H), lambda t: (0, 0)),           # weights: resident
            pl.BlockSpec((H, 4 * H), lambda t: (0, 0)),
            pl.BlockSpec((1, 4 * H), lambda t: (0, 0)),
            pl.BlockSpec((H, O), lambda t: (0, 0)),
            pl.BlockSpec((1, O), lambda t: (0, 0)),
        ],
        out_specs=pl.BlockSpec((B_pad, O), lambda t: (0, 0)),
        scratch_shapes=[
            pltpu.VMEM((B_pad, H), jnp.float32),                  # h carry
            pltpu.VMEM((B_pad, H), jnp.float32),                  # c carry
            pltpu.VMEM((t_blk * B_pad, 4 * H), jnp.float32),      # hoisted input proj
        ],
    )

    out = pl.pallas_call(
        kernel,
        out_shape=jax.ShapeDtypeStruct((B_pad, O), jnp.float32),
        grid_spec=grid_spec,
        compiler_params=pltpu.CompilerParams(
            # The time grid carries the recurrence -> must run sequentially.
            dimension_semantics=("arbitrary",),
            vmem_limit_bytes=vmem_limit),
    )(x_flat, w_ih_t, w_hh_t, bias, w_fc_t, b_fc2)
    return out[:B]


def reference_forward(x, params):
    """Plain-JAX f32 reference reproducing torch.nn.LSTM + Linear semantics."""
    w_ih, w_hh, b_ih, b_hh, w_fc, b_fc = params
    B, T, _ = x.shape
    H = w_hh.shape[1]
    h = jnp.zeros((B, H), jnp.float32)
    c = jnp.zeros((B, H), jnp.float32)
    for t in range(T):
        gates = x[:, t] @ w_ih.T + b_ih + h @ w_hh.T + b_hh
        i = jax.nn.sigmoid(gates[:, 0 * H:1 * H])
        f = jax.nn.sigmoid(gates[:, 1 * H:2 * H])
        g = jnp.tanh(gates[:, 2 * H:3 * H])
        o = jax.nn.sigmoid(gates[:, 3 * H:4 * H])
        c = f * c + i * g
        h = o * jnp.tanh(c)
    return h @ w_fc.T + b_fc


if __name__ == "__main__":
    # Small shapes consistent with the module's forward:
    # x: (batch, seq, input_size); hidden chosen at 32 for tile friendliness.
    B, T, I, H, O = 2, 8, 1, 32, 1

    key = jax.random.PRNGKey(0)
    k_x, k_p, k_x2 = jax.random.split(key, 3)
    x = jax.random.normal(k_x, (B, T, I), jnp.float32)
    params = init_params(k_p, I, H, O)
    prepped = prepare_params(params)

    # Case 1: short sequence -> single grid step, fully-unrolled recurrence.
    out = jax.block_until_ready(lstm_model_forward(x, prepped))
    ref = reference_forward(x, params)
    assert out.shape == (B, O)
    # bf16 MXU recurrence vs. f32 reference -> loose-but-tight tolerance.
    assert jnp.allclose(out, ref, atol=1e-2, rtol=1e-2), (out, ref)

    # Case 2: longer sequence -> multi-block grid with T padding + masking and the
    # partially-unrolled fori_loop recurrence path.
    T2 = 40
    x2 = jax.random.normal(k_x2, (B, T2, I), jnp.float32)
    out2 = jax.block_until_ready(lstm_model_forward(x2, prepped, t_blk=32))
    ref2 = reference_forward(x2, params)
    assert out2.shape == (B, O)
    assert jnp.allclose(out2, ref2, atol=1e-2, rtol=1e-2), (out2, ref2)

    print("KERNEL_OK")
</pallas_src>

<mosaic_0001>
module attributes {stable_mosaic.version = 11 : i64} {
  func.func @lstm_fc_kernel(%arg0: i32, %arg1: memref<64x1xf32, #tpu.memory_space<vmem>>, %arg2: memref<1x128xf32, #tpu.memory_space<vmem>>, %arg3: memref<32x128xbf16, #tpu.memory_space<vmem>>, %arg4: memref<1x128xf32, #tpu.memory_space<vmem>>, %arg5: memref<32x1xbf16, #tpu.memory_space<vmem>>, %arg6: memref<1x1xf32, #tpu.memory_space<vmem>>, %arg7: memref<8x1xf32, #tpu.memory_space<vmem>>, %arg8: memref<8x32xf32, #tpu.memory_space<vmem>>, %arg9: memref<8x32xf32, #tpu.memory_space<vmem>>, %arg10: memref<64x128xf32, #tpu.memory_space<vmem>>) attributes {dimension_semantics = [#tpu.dimension_semantics<arbitrary>], iteration_bounds = array<i64: 1>, scalar_prefetch = 0 : i64, scratch_operands = 3 : i64, tpu.core_type = #tpu.core_type<tc>, window_params = [{transform_indices = @transform_0, window_bounds = array<i64: 64, 1>}, {pipeline_mode = #tpu.pipeline_mode<synchronous>, transform_indices = @transform_1, window_bounds = array<i64: 1, 128>}, {pipeline_mode = #tpu.pipeline_mode<synchronous>, transform_indices = @transform_2, window_bounds = array<i64: 32, 128>}, {pipeline_mode = #tpu.pipeline_mode<synchronous>, transform_indices = @transform_3, window_bounds = array<i64: 1, 128>}, {pipeline_mode = #tpu.pipeline_mode<synchronous>, transform_indices = @transform_4, window_bounds = array<i64: 32, 1>}, {pipeline_mode = #tpu.pipeline_mode<synchronous>, transform_indices = @transform_5, window_bounds = array<i64: 1, 1>}, {pipeline_mode = #tpu.pipeline_mode<synchronous>, transform_indices = @transform_6, window_bounds = array<i64: 8, 1>}]} {
    %c0_i32 = arith.constant 0 : i32
    %0 = arith.cmpi eq, %arg0, %c0_i32 : i32
    %1 = arith.extui %0 : i1 to i32
    %c0_i32_0 = arith.constant 0 : i32
    %2 = arith.cmpi ne, %1, %c0_i32_0 : i32
    scf.if %2 {
      %cst_89 = arith.constant 0.000000e+00 : f32
      %244 = vector.broadcast %cst_89 : f32 to vector<8x32xf32>
      %c0_90 = arith.constant 0 : index
      %c0_91 = arith.constant 0 : index
      %245 = vector.load %arg8[%c0_90, %c0_91] : memref<8x32xf32, #tpu.memory_space<vmem>>, vector<8x32xf32>
      tpu.vector_store %arg8[%c0_90, %c0_91], %244 {strides = array<i32>} : memref<8x32xf32, #tpu.memory_space<vmem>>, vector<8x32xf32>,
      %cst_92 = arith.constant 0.000000e+00 : f32
      %246 = vector.broadcast %cst_92 : f32 to vector<8x32xf32>
      %c0_93 = arith.constant 0 : index
      %c0_94 = arith.constant 0 : index
      %247 = vector.load %arg9[%c0_93, %c0_94] : memref<8x32xf32, #tpu.memory_space<vmem>>, vector<8x32xf32>
      tpu.vector_store %arg9[%c0_93, %c0_94], %246 {strides = array<i32>} : memref<8x32xf32, #tpu.memory_space<vmem>>, vector<8x32xf32>,
    } else {
    }
    %c0 = arith.constant 0 : index
    %c0_1 = arith.constant 0 : index
    %3 = vector.load %arg1[%c0, %c0_1] : memref<64x1xf32, #tpu.memory_space<vmem>>, vector<64x1xf32>
    %c0_2 = arith.constant 0 : index
    %c0_3 = arith.constant 0 : index
    %4 = vector.load %arg2[%c0_2, %c0_3] : memref<1x128xf32, #tpu.memory_space<vmem>>, vector<1x128xf32>
    %5 = vector.broadcast %3 : vector<64x1xf32> to vector<64x128xf32>
    %6 = vector.broadcast %4 : vector<1x128xf32> to vector<64x128xf32>
    %7 = arith.mulf %5, %6 : vector<64x128xf32>
    %c0_4 = arith.constant 0 : index
    %c0_5 = arith.constant 0 : index
    %8 = vector.load %arg4[%c0_4, %c0_5] : memref<1x128xf32, #tpu.memory_space<vmem>>, vector<1x128xf32>
    %9 = vector.broadcast %8 : vector<1x128xf32> to vector<64x128xf32>
    %10 = arith.addf %7, %9 : vector<64x128xf32>
    %c0_6 = arith.constant 0 : index
    %c0_7 = arith.constant 0 : index
    %11 = vector.load %arg10[%c0_6, %c0_7] : memref<64x128xf32, #tpu.memory_space<vmem>>, vector<64x128xf32>
    tpu.vector_store %arg10[%c0_6, %c0_7], %10 {strides = array<i32>} : memref<64x128xf32, #tpu.memory_space<vmem>>, vector<64x128xf32>,
    %c0_8 = arith.constant 0 : index
    %c0_9 = arith.constant 0 : index
    %12 = vector.load %arg3[%c0_8, %c0_9] : memref<32x128xbf16, #tpu.memory_space<vmem>>, vector<32x128xbf16>
    %c0_10 = arith.constant 0 : index
    %c0_11 = arith.constant 0 : index
    %13 = vector.load %arg8[%c0_10, %c0_11] : memref<8x32xf32, #tpu.memory_space<vmem>>, vector<8x32xf32>
    %c0_12 = arith.constant 0 : index
    %c0_13 = arith.constant 0 : index
    %14 = vector.load %arg9[%c0_12, %c0_13] : memref<8x32xf32, #tpu.memory_space<vmem>>, vector<8x32xf32>
    %c0_i32_14 = arith.constant 0 : i32
    %c8_i32 = arith.constant 8 : i32
    %15 = arith.muli %c0_i32_14, %c8_i32 : i32
    %16 = tpu.assume_multiple %15, 8 : i32
    %17 = arith.index_cast %16 : i32 to index
    %c0_15 = arith.constant 0 : index
    %18 = vector.load %arg10[%17, %c0_15] : memref<64x128xf32, #tpu.memory_space<vmem>>, vector<8x128xf32>
    %19 = arith.truncf %13 : vector<8x32xf32> to vector<8x32xbf16>
    %cst = arith.constant dense<0.000000e+00> : vector<8x128xf32>
    %20 = tpu.matmul %19, %12, %cst {dimension_numbers = #tpu.dot_dimension_numbers<[1], [0], [0], [1], [0, 0, 1, 1], [], []>} : vector<8x32xbf16>, vector<32x128xbf16>, vector<8x128xf32> -> vector<8x128xf32>
    %21 = arith.addf %18, %20 : vector<8x128xf32>
    %22 = arith.negf %21 : vector<8x128xf32>
    %23 = math.exp %22 : vector<8x128xf32>
    %cst_16 = arith.constant 1.000000e+00 : f32
    %24 = vector.broadcast %cst_16 : f32 to vector<8x128xf32>
    %25 = arith.addf %24, %23 : vector<8x128xf32>
    %26 = arith.divf %24, %25 : vector<8x128xf32>
    %c96_i32 = arith.constant 96 : i32
    %27 = tpu.dynamic_rotate %26 by %c96_i32 dim 1 : vector<8x128xf32>, i32 -> vector<8x128xf32>
    %c64_i32 = arith.constant 64 : i32
    %28 = tpu.dynamic_rotate %26 by %c64_i32 dim 1 : vector<8x128xf32>, i32 -> vector<8x128xf32>
    %c32_i32 = arith.constant 32 : i32
    %29 = tpu.dynamic_rotate %26 by %c32_i32 dim 1 : vector<8x128xf32>, i32 -> vector<8x128xf32>
    %30 = vector.extract_strided_slice %26 {offsets = [0, 0], sizes = [8, 32], strides = [1, 1]} : vector<8x128xf32> to vector<8x32xf32>
    %31 = vector.extract_strided_slice %27 {offsets = [0, 0], sizes = [8, 32], strides = [1, 1]} : vector<8x128xf32> to vector<8x32xf32>
    %32 = vector.extract_strided_slice %28 {offsets = [0, 0], sizes = [8, 32], strides = [1, 1]} : vector<8x128xf32> to vector<8x32xf32>
    %cst_17 = arith.constant 2.000000e+00 : f32
    %33 = vector.broadcast %cst_17 : f32 to vector<8x32xf32>
    %34 = arith.mulf %33, %32 : vector<8x32xf32>
    %cst_18 = arith.constant 1.000000e+00 : f32
    %35 = vector.broadcast %cst_18 : f32 to vector<8x32xf32>
    %36 = arith.subf %34, %35 : vector<8x32xf32>
    %37 = vector.extract_strided_slice %29 {offsets = [0, 0], sizes = [8, 32], strides = [1, 1]} : vector<8x128xf32> to vector<8x32xf32>
    %38 = arith.mulf %31, %14 : vector<8x32xf32>
    %39 = arith.mulf %30, %36 : vector<8x32xf32>
    %40 = arith.addf %38, %39 : vector<8x32xf32>
    %41 = math.tanh %40 : vector<8x32xf32>
    %42 = arith.mulf %37, %41 : vector<8x32xf32>
    %c1_i32 = arith.constant 1 : i32
    %c8_i32_19 = arith.constant 8 : i32
    %43 = arith.muli %c1_i32, %c8_i32_19 : i32
    %44 = tpu.assume_multiple %43, 8 : i32
    %45 = arith.index_cast %44 : i32 to index
    %c0_20 = arith.constant 0 : index
    %46 = vector.load %arg10[%45, %c0_20] : memref<64x128xf32, #tpu.memory_space<vmem>>, vector<8x128xf32>
    %47 = arith.truncf %42 : vector<8x32xf32> to vector<8x32xbf16>
    %cst_21 = arith.constant dense<0.000000e+00> : vector<8x128xf32>
    %48 = tpu.matmul %47, %12, %cst_21 {dimension_numbers = #tpu.dot_dimension_numbers<[1], [0], [0], [1], [0, 0, 1, 1], [], []>} : vector<8x32xbf16>, vector<32x128xbf16>, vector<8x128xf32> -> vector<8x128xf32>
    %49 = arith.addf %46, %48 : vector<8x128xf32>
    %50 = arith.negf %49 : vector<8x128xf32>
    %51 = math.exp %50 : vector<8x128xf32>
    %cst_22 = arith.constant 1.000000e+00 : f32
    %52 = vector.broadcast %cst_22 : f32 to vector<8x128xf32>
    %53 = arith.addf %52, %51 : vector<8x128xf32>
    %54 = arith.divf %52, %53 : vector<8x128xf32>
    %c96_i32_23 = arith.constant 96 : i32
    %55 = tpu.dynamic_rotate %54 by %c96_i32_23 dim 1 : vector<8x128xf32>, i32 -> vector<8x128xf32>
    %c64_i32_24 = arith.constant 64 : i32
    %56 = tpu.dynamic_rotate %54 by %c64_i32_24 dim 1 : vector<8x128xf32>, i32 -> vector<8x128xf32>
    %c32_i32_25 = arith.constant 32 : i32
    %57 = tpu.dynamic_rotate %54 by %c32_i32_25 dim 1 : vector<8x128xf32>, i32 -> vector<8x128xf32>
    %58 = vector.extract_strided_slice %54 {offsets = [0, 0], sizes = [8, 32], strides = [1, 1]} : vector<8x128xf32> to vector<8x32xf32>
    %59 = vector.extract_strided_slice %55 {offsets = [0, 0], sizes = [8, 32], strides = [1, 1]} : vector<8x128xf32> to vector<8x32xf32>
    %60 = vector.extract_strided_slice %56 {offsets = [0, 0], sizes = [8, 32], strides = [1, 1]} : vector<8x128xf32> to vector<8x32xf32>
    %cst_26 = arith.constant 2.000000e+00 : f32
    %61 = vector.broadcast %cst_26 : f32 to vector<8x32xf32>
    %62 = arith.mulf %61, %60 : vector<8x32xf32>
    %cst_27 = arith.constant 1.000000e+00 : f32
    %63 = vector.broadcast %cst_27 : f32 to vector<8x32xf32>
    %64 = arith.subf %62, %63 : vector<8x32xf32>
    %65 = vector.extract_strided_slice %57 {offsets = [0, 0], sizes = [8, 32], strides = [1, 1]} : vector<8x128xf32> to vector<8x32xf32>
    %66 = arith.mulf %59, %40 : vector<8x32xf32>
    %67 = arith.mulf %58, %64 : vector<8x32xf32>
    %68 = arith.addf %66, %67 : vector<8x32xf32>
    %69 = math.tanh %68 : vector<8x32xf32>
    %70 = arith.mulf %65, %69 : vector<8x32xf32>
    %c2_i32 = arith.constant 2 : i32
    %c8_i32_28 = arith.constant 8 : i32
    %71 = arith.muli %c2_i32, %c8_i32_28 : i32
    %72 = tpu.assume_multiple %71, 8 : i32
    %73 = arith.index_cast %72 : i32 to index
    %c0_29 = arith.constant 0 : index
    %74 = vector.load %arg10[%73, %c0_29] : memref<64x128xf32, #tpu.memory_space<vmem>>, vector<8x128xf32>
    %75 = arith.truncf %70 : vector<8x32xf32> to vector<8x32xbf16>
    %cst_30 = arith.constant dense<0.000000e+00> : vector<8x128xf32>
    %76 = tpu.matmul %75, %12, %cst_30 {dimension_numbers = #tpu.dot_dimension_numbers<[1], [0], [0], [1], [0, 0, 1, 1], [], []>} : vector<8x32xbf16>, vector<32x128xbf16>, vector<8x128xf32> -> vector<8x128xf32>
    %77 = arith.addf %74, %76 : vector<8x128xf32>
    %78 = arith.negf %77 : vector<8x128xf32>
    %79 = math.exp %78 : vector<8x128xf32>
    %cst_31 = arith.constant 1.000000e+00 : f32
    %80 = vector.broadcast %cst_31 : f32 to vector<8x128xf32>
    %81 = arith.addf %80, %79 : vector<8x128xf32>
    %82 = arith.divf %80, %81 : vector<8x128xf32>
    %c96_i32_32 = arith.constant 96 : i32
    %83 = tpu.dynamic_rotate %82 by %c96_i32_32 dim 1 : vector<8x128xf32>, i32 -> vector<8x128xf32>
    %c64_i32_33 = arith.constant 64 : i32
    %84 = tpu.dynamic_rotate %82 by %c64_i32_33 dim 1 : vector<8x128xf32>, i32 -> vector<8x128xf32>
    %c32_i32_34 = arith.constant 32 : i32
    %85 = tpu.dynamic_rotate %82 by %c32_i32_34 dim 1 : vector<8x128xf32>, i32 -> vector<8x128xf32>
    %86 = vector.extract_strided_slice %82 {offsets = [0, 0], sizes = [8, 32], strides = [1, 1]} : vector<8x128xf32> to vector<8x32xf32>
    %87 = vector.extract_strided_slice %83 {offsets = [0, 0], sizes = [8, 32], strides = [1, 1]} : vector<8x128xf32> to vector<8x32xf32>
    %88 = vector.extract_strided_slice %84 {offsets = [0, 0], sizes = [8, 32], strides = [1, 1]} : vector<8x128xf32> to vector<8x32xf32>
    %cst_35 = arith.constant 2.000000e+00 : f32
    %89 = vector.broadcast %cst_35 : f32 to vector<8x32xf32>
    %90 = arith.mulf %89, %88 : vector<8x32xf32>
    %cst_36 = arith.constant 1.000000e+00 : f32
    %91 = vector.broadcast %cst_36 : f32 to vector<8x32xf32>
    %92 = arith.subf %90, %91 : vector<8x32xf32>
    %93 = vector.extract_strided_slice %85 {offsets = [0, 0], sizes = [8, 32], strides = [1, 1]} : vector<8x128xf32> to vector<8x32xf32>
    %94 = arith.mulf %87, %68 : vector<8x32xf32>
    %95 = arith.mulf %86, %92 : vector<8x32xf32>
    %96 = arith.addf %94, %95 : vector<8x32xf32>
    %97 = math.tanh %96 : vector<8x32xf32>
    %98 = arith.mulf %93, %97 : vector<8x32xf32>
    %c3_i32 = arith.constant 3 : i32
    %c8_i32_37 = arith.constant 8 : i32
    %99 = arith.muli %c3_i32, %c8_i32_37 : i32
    %100 = tpu.assume_multiple %99, 8 : i32
    %101 = arith.index_cast %100 : i32 to index
    %c0_38 = arith.constant 0 : index
    %102 = vector.load %arg10[%101, %c0_38] : memref<64x128xf32, #tpu.memory_space<vmem>>, vector<8x128xf32>
    %103 = arith.truncf %98 : vector<8x32xf32> to vector<8x32xbf16>
    %cst_39 = arith.constant dense<0.000000e+00> : vector<8x128xf32>
    %104 = tpu.matmul %103, %12, %cst_39 {dimension_numbers = #tpu.dot_dimension_numbers<[1], [0], [0], [1], [0, 0, 1, 1], [], []>} : vector<8x32xbf16>, vector<32x128xbf16>, vector<8x128xf32> -> vector<8x128xf32>
    %105 = arith.addf %102, %104 : vector<8x128xf32>
    %106 = arith.negf %105 : vector<8x128xf32>
    %107 = math.exp %106 : vector<8x128xf32>
    %cst_40 = arith.constant 1.000000e+00 : f32
    %108 = vector.broadcast %cst_40 : f32 to vector<8x128xf32>
    %109 = arith.addf %108, %107 : vector<8x128xf32>
    %110 = arith.divf %108, %109 : vector<8x128xf32>
    %c96_i32_41 = arith.constant 96 : i32
    %111 = tpu.dynamic_rotate %110 by %c96_i32_41 dim 1 : vector<8x128xf32>, i32 -> vector<8x128xf32>
    %c64_i32_42 = arith.constant 64 : i32
    %112 = tpu.dynamic_rotate %110 by %c64_i32_42 dim 1 : vector<8x128xf32>, i32 -> vector<8x128xf32>
    %c32_i32_43 = arith.constant 32 : i32
    %113 = tpu.dynamic_rotate %110 by %c32_i32_43 dim 1 : vector<8x128xf32>, i32 -> vector<8x128xf32>
    %114 = vector.extract_strided_slice %110 {offsets = [0, 0], sizes = [8, 32], strides = [1, 1]} : vector<8x128xf32> to vector<8x32xf32>
    %115 = vector.extract_strided_slice %111 {offsets = [0, 0], sizes = [8, 32], strides = [1, 1]} : vector<8x128xf32> to vector<8x32xf32>
    %116 = vector.extract_strided_slice %112 {offsets = [0, 0], sizes = [8, 32], strides = [1, 1]} : vector<8x128xf32> to vector<8x32xf32>
    %cst_44 = arith.constant 2.000000e+00 : f32
    %117 = vector.broadcast %cst_44 : f32 to vector<8x32xf32>
    %118 = arith.mulf %117, %116 : vector<8x32xf32>
    %cst_45 = arith.constant 1.000000e+00 : f32
    %119 = vector.broadcast %cst_45 : f32 to vector<8x32xf32>
    %120 = arith.subf %118, %119 : vector<8x32xf32>
    %121 = vector.extract_strided_slice %113 {offsets = [0, 0], sizes = [8, 32], strides = [1, 1]} : vector<8x128xf32> to vector<8x32xf32>
    %122 = arith.mulf %115, %96 : vector<8x32xf32>
    %123 = arith.mulf %114, %120 : vector<8x32xf32>
    %124 = arith.addf %122, %123 : vector<8x32xf32>
    %125 = math.tanh %124 : vector<8x32xf32>
    %126 = arith.mulf %121, %125 : vector<8x32xf32>
    %c4_i32 = arith.constant 4 : i32
    %c8_i32_46 = arith.constant 8 : i32
    %127 = arith.muli %c4_i32, %c8_i32_46 : i32
    %128 = tpu.assume_multiple %127, 8 : i32
    %129 = arith.index_cast %128 : i32 to index
    %c0_47 = arith.constant 0 : index
    %130 = vector.load %arg10[%129, %c0_47] : memref<64x128xf32, #tpu.memory_space<vmem>>, vector<8x128xf32>
    %131 = arith.truncf %126 : vector<8x32xf32> to vector<8x32xbf16>
    %cst_48 = arith.constant dense<0.000000e+00> : vector<8x128xf32>
    %132 = tpu.matmul %131, %12, %cst_48 {dimension_numbers = #tpu.dot_dimension_numbers<[1], [0], [0], [1], [0, 0, 1, 1], [], []>} : vector<8x32xbf16>, vector<32x128xbf16>, vector<8x128xf32> -> vector<8x128xf32>
    %133 = arith.addf %130, %132 : vector<8x128xf32>
    %134 = arith.negf %133 : vector<8x128xf32>
    %135 = math.exp %134 : vector<8x128xf32>
    %cst_49 = arith.constant 1.000000e+00 : f32
    %136 = vector.broadcast %cst_49 : f32 to vector<8x128xf32>
    %137 = arith.addf %136, %135 : vector<8x128xf32>
    %138 = arith.divf %136, %137 : vector<8x128xf32>
    %c96_i32_50 = arith.constant 96 : i32
    %139 = tpu.dynamic_rotate %138 by %c96_i32_50 dim 1 : vector<8x128xf32>, i32 -> vector<8x128xf32>
    %c64_i32_51 = arith.constant 64 : i32
    %140 = tpu.dynamic_rotate %138 by %c64_i32_51 dim 1 : vector<8x128xf32>, i32 -> vector<8x128xf32>
    %c32_i32_52 = arith.constant 32 : i32
    %141 = tpu.dynamic_rotate %138 by %c32_i32_52 dim 1 : vector<8x128xf32>, i32 -> vector<8x128xf32>
    %142 = vector.extract_strided_slice %138 {offsets = [0, 0], sizes = [8, 32], strides = [1, 1]} : vector<8x128xf32> to vector<8x32xf32>
    %143 = vector.extract_strided_slice %139 {offsets = [0, 0], sizes = [8, 32], strides = [1, 1]} : vector<8x128xf32> to vector<8x32xf32>
    %144 = vector.extract_strided_slice %140 {offsets = [0, 0], sizes = [8, 32], strides = [1, 1]} : vector<8x128xf32> to vector<8x32xf32>
    %cst_53 = arith.constant 2.000000e+00 : f32
    %145 = vector.broadcast %cst_53 : f32 to vector<8x32xf32>
    %146 = arith.mulf %145, %144 : vector<8x32xf32>
    %cst_54 = arith.constant 1.000000e+00 : f32
    %147 = vector.broadcast %cst_54 : f32 to vector<8x32xf32>
    %148 = arith.subf %146, %147 : vector<8x32xf32>
    %149 = vector.extract_strided_slice %141 {offsets = [0, 0], sizes = [8, 32], strides = [1, 1]} : vector<8x128xf32> to vector<8x32xf32>
    %150 = arith.mulf %143, %124 : vector<8x32xf32>
    %151 = arith.mulf %142, %148 : vector<8x32xf32>
    %152 = arith.addf %150, %151 : vector<8x32xf32>
    %153 = math.tanh %152 : vector<8x32xf32>
    %154 = arith.mulf %149, %153 : vector<8x32xf32>
    %c5_i32 = arith.constant 5 : i32
    %c8_i32_55 = arith.constant 8 : i32
    %155 = arith.muli %c5_i32, %c8_i32_55 : i32
    %156 = tpu.assume_multiple %155, 8 : i32
    %157 = arith.index_cast %156 : i32 to index
    %c0_56 = arith.constant 0 : index
    %158 = vector.load %arg10[%157, %c0_56] : memref<64x128xf32, #tpu.memory_space<vmem>>, vector<8x128xf32>
    %159 = arith.truncf %154 : vector<8x32xf32> to vector<8x32xbf16>
    %cst_57 = arith.constant dense<0.000000e+00> : vector<8x128xf32>
    %160 = tpu.matmul %159, %12, %cst_57 {dimension_numbers = #tpu.dot_dimension_numbers<[1], [0], [0], [1], [0, 0, 1, 1], [], []>} : vector<8x32xbf16>, vector<32x128xbf16>, vector<8x128xf32> -> vector<8x128xf32>
    %161 = arith.addf %158, %160 : vector<8x128xf32>
    %162 = arith.negf %161 : vector<8x128xf32>
    %163 = math.exp %162 : vector<8x128xf32>
    %cst_58 = arith.constant 1.000000e+00 : f32
    %164 = vector.broadcast %cst_58 : f32 to vector<8x128xf32>
    %165 = arith.addf %164, %163 : vector<8x128xf32>
    %166 = arith.divf %164, %165 : vector<8x128xf32>
    %c96_i32_59 = arith.constant 96 : i32
    %167 = tpu.dynamic_rotate %166 by %c96_i32_59 dim 1 : vector<8x128xf32>, i32 -> vector<8x128xf32>
    %c64_i32_60 = arith.constant 64 : i32
    %168 = tpu.dynamic_rotate %166 by %c64_i32_60 dim 1 : vector<8x128xf32>, i32 -> vector<8x128xf32>
    %c32_i32_61 = arith.constant 32 : i32
    %169 = tpu.dynamic_rotate %166 by %c32_i32_61 dim 1 : vector<8x128xf32>, i32 -> vector<8x128xf32>
    %170 = vector.extract_strided_slice %166 {offsets = [0, 0], sizes = [8, 32], strides = [1, 1]} : vector<8x128xf32> to vector<8x32xf32>
    %171 = vector.extract_strided_slice %167 {offsets = [0, 0], sizes = [8, 32], strides = [1, 1]} : vector<8x128xf32> to vector<8x32xf32>
    %172 = vector.extract_strided_slice %168 {offsets = [0, 0], sizes = [8, 32], strides = [1, 1]} : vector<8x128xf32> to vector<8x32xf32>
    %cst_62 = arith.constant 2.000000e+00 : f32
    %173 = vector.broadcast %cst_62 : f32 to vector<8x32xf32>
    %174 = arith.mulf %173, %172 : vector<8x32xf32>
    %cst_63 = arith.constant 1.000000e+00 : f32
    %175 = vector.broadcast %cst_63 : f32 to vector<8x32xf32>
    %176 = arith.subf %174, %175 : vector<8x32xf32>
    %177 = vector.extract_strided_slice %169 {offsets = [0, 0], sizes = [8, 32], strides = [1, 1]} : vector<8x128xf32> to vector<8x32xf32>
    %178 = arith.mulf %171, %152 : vector<8x32xf32>
    %179 = arith.mulf %170, %176 : vector<8x32xf32>
    %180 = arith.addf %178, %179 : vector<8x32xf32>
    %181 = math.tanh %180 : vector<8x32xf32>
    %182 = arith.mulf %177, %181 : vector<8x32xf32>
    %c6_i32 = arith.constant 6 : i32
    %c8_i32_64 = arith.constant 8 : i32
    %183 = arith.muli %c6_i32, %c8_i32_64 : i32
    %184 = tpu.assume_multiple %183, 8 : i32
    %185 = arith.index_cast %184 : i32 to index
    %c0_65 = arith.constant 0 : index
    %186 = vector.load %arg10[%185, %c0_65] : memref<64x128xf32, #tpu.memory_space<vmem>>, vector<8x128xf32>
    %187 = arith.truncf %182 : vector<8x32xf32> to vector<8x32xbf16>
    %cst_66 = arith.constant dense<0.000000e+00> : vector<8x128xf32>
    %188 = tpu.matmul %187, %12, %cst_66 {dimension_numbers = #tpu.dot_dimension_numbers<[1], [0], [0], [1], [0, 0, 1, 1], [], []>} : vector<8x32xbf16>, vector<32x128xbf16>, vector<8x128xf32> -> vector<8x128xf32>
    %189 = arith.addf %186, %188 : vector<8x128xf32>
    %190 = arith.negf %189 : vector<8x128xf32>
    %191 = math.exp %190 : vector<8x128xf32>
    %cst_67 = arith.constant 1.000000e+00 : f32
    %192 = vector.broadcast %cst_67 : f32 to vector<8x128xf32>
    %193 = arith.addf %192, %191 : vector<8x128xf32>
    %194 = arith.divf %192, %193 : vector<8x128xf32>
    %c96_i32_68 = arith.constant 96 : i32
    %195 = tpu.dynamic_rotate %194 by %c96_i32_68 dim 1 : vector<8x128xf32>, i32 -> vector<8x128xf32>
    %c64_i32_69 = arith.constant 64 : i32
    %196 = tpu.dynamic_rotate %194 by %c64_i32_69 dim 1 : vector<8x128xf32>, i32 -> vector<8x128xf32>
    %c32_i32_70 = arith.constant 32 : i32
    %197 = tpu.dynamic_rotate %194 by %c32_i32_70 dim 1 : vector<8x128xf32>, i32 -> vector<8x128xf32>
    %198 = vector.extract_strided_slice %194 {offsets = [0, 0], sizes = [8, 32], strides = [1, 1]} : vector<8x128xf32> to vector<8x32xf32>
    %199 = vector.extract_strided_slice %195 {offsets = [0, 0], sizes = [8, 32], strides = [1, 1]} : vector<8x128xf32> to vector<8x32xf32>
    %200 = vector.extract_strided_slice %196 {offsets = [0, 0], sizes = [8, 32], strides = [1, 1]} : vector<8x128xf32> to vector<8x32xf32>
    %cst_71 = arith.constant 2.000000e+00 : f32
    %201 = vector.broadcast %cst_71 : f32 to vector<8x32xf32>
    %202 = arith.mulf %201, %200 : vector<8x32xf32>
    %cst_72 = arith.constant 1.000000e+00 : f32
    %203 = vector.broadcast %cst_72 : f32 to vector<8x32xf32>
    %204 = arith.subf %202, %203 : vector<8x32xf32>
    %205 = vector.extract_strided_slice %197 {offsets = [0, 0], sizes = [8, 32], strides = [1, 1]} : vector<8x128xf32> to vector<8x32xf32>
    %206 = arith.mulf %199, %180 : vector<8x32xf32>
    %207 = arith.mulf %198, %204 : vector<8x32xf32>
    %208 = arith.addf %206, %207 : vector<8x32xf32>
    %209 = math.tanh %208 : vector<8x32xf32>
    %210 = arith.mulf %205, %209 : vector<8x32xf32>
    %c7_i32 = arith.constant 7 : i32
    %c8_i32_73 = arith.constant 8 : i32
    %211 = arith.muli %c7_i32, %c8_i32_73 : i32
    %212 = tpu.assume_multiple %211, 8 : i32
    %213 = arith.index_cast %212 : i32 to index
    %c0_74 = arith.constant 0 : index
    %214 = vector.load %arg10[%213, %c0_74] : memref<64x128xf32, #tpu.memory_space<vmem>>, vector<8x128xf32>
    %215 = arith.truncf %210 : vector<8x32xf32> to vector<8x32xbf16>
    %cst_75 = arith.constant dense<0.000000e+00> : vector<8x128xf32>
    %216 = tpu.matmul %215, %12, %cst_75 {dimension_numbers = #tpu.dot_dimension_numbers<[1], [0], [0], [1], [0, 0, 1, 1], [], []>} : vector<8x32xbf16>, vector<32x128xbf16>, vector<8x128xf32> -> vector<8x128xf32>
    %217 = arith.addf %214, %216 : vector<8x128xf32>
    %218 = arith.negf %217 : vector<8x128xf32>
    %219 = math.exp %218 : vector<8x128xf32>
    %cst_76 = arith.constant 1.000000e+00 : f32
    %220 = vector.broadcast %cst_76 : f32 to vector<8x128xf32>
    %221 = arith.addf %220, %219 : vector<8x128xf32>
    %222 = arith.divf %220, %221 : vector<8x128xf32>
    %c96_i32_77 = arith.constant 96 : i32
    %223 = tpu.dynamic_rotate %222 by %c96_i32_77 dim 1 : vector<8x128xf32>, i32 -> vector<8x128xf32>
    %c64_i32_78 = arith.constant 64 : i32
    %224 = tpu.dynamic_rotate %222 by %c64_i32_78 dim 1 : vector<8x128xf32>, i32 -> vector<8x128xf32>
    %c32_i32_79 = arith.constant 32 : i32
    %225 = tpu.dynamic_rotate %222 by %c32_i32_79 dim 1 : vector<8x128xf32>, i32 -> vector<8x128xf32>
    %226 = vector.extract_strided_slice %222 {offsets = [0, 0], sizes = [8, 32], strides = [1, 1]} : vector<8x128xf32> to vector<8x32xf32>
    %227 = vector.extract_strided_slice %223 {offsets = [0, 0], sizes = [8, 32], strides = [1, 1]} : vector<8x128xf32> to vector<8x32xf32>
    %228 = vector.extract_strided_slice %224 {offsets = [0, 0], sizes = [8, 32], strides = [1, 1]} : vector<8x128xf32> to vector<8x32xf32>
    %cst_80 = arith.constant 2.000000e+00 : f32
    %229 = vector.broadcast %cst_80 : f32 to vector<8x32xf32>
    %230 = arith.mulf %229, %228 : vector<8x32xf32>
    %cst_81 = arith.constant 1.000000e+00 : f32
    %231 = vector.broadcast %cst_81 : f32 to vector<8x32xf32>
    %232 = arith.subf %230, %231 : vector<8x32xf32>
    %233 = vector.extract_strided_slice %225 {offsets = [0, 0], sizes = [8, 32], strides = [1, 1]} : vector<8x128xf32> to vector<8x32xf32>
    %234 = arith.mulf %227, %208 : vector<8x32xf32>
    %235 = arith.mulf %226, %232 : vector<8x32xf32>
    %236 = arith.addf %234, %235 : vector<8x32xf32>
    %237 = math.tanh %236 : vector<8x32xf32>
    %238 = arith.mulf %233, %237 : vector<8x32xf32>
    %c8_i32_82 = arith.constant 8 : i32
    %c0_83 = arith.constant 0 : index
    %c0_84 = arith.constant 0 : index
    %239 = vector.load %arg8[%c0_83, %c0_84] : memref<8x32xf32, #tpu.memory_space<vmem>>, vector<8x32xf32>
    tpu.vector_store %arg8[%c0_83, %c0_84], %238 {strides = array<i32>} : memref<8x32xf32, #tpu.memory_space<vmem>>, vector<8x32xf32>,
    %c0_85 = arith.constant 0 : index
    %c0_86 = arith.constant 0 : index
    %240 = vector.load %arg9[%c0_85, %c0_86] : memref<8x32xf32, #tpu.memory_space<vmem>>, vector<8x32xf32>
    tpu.vector_store %arg9[%c0_85, %c0_86], %236 {strides = array<i32>} : memref<8x32xf32, #tpu.memory_space<vmem>>, vector<8x32xf32>,
    %c0_i32_87 = arith.constant 0 : i32
    %241 = arith.cmpi eq, %arg0, %c0_i32_87 : i32
    %242 = arith.extui %241 : i1 to i32
    %c0_i32_88 = arith.constant 0 : i32
    %243 = arith.cmpi ne, %242, %c0_i32_88 : i32
    scf.if %243 {
      %244 = arith.truncf %238 : vector<8x32xf32> to vector<8x32xbf16>
      %c0_89 = arith.constant 0 : index
      %c0_90 = arith.constant 0 : index
      %245 = vector.load %arg5[%c0_89, %c0_90] : memref<32x1xbf16, #tpu.memory_space<vmem>>, vector<32x1xbf16>
      %cst_91 = arith.constant dense<0.000000e+00> : vector<8x1xf32>
      %246 = tpu.matmul %244, %245, %cst_91 {dimension_numbers = #tpu.dot_dimension_numbers<[1], [0], [0], [1], [0, 0, 1, 1], [], []>} : vector<8x32xbf16>, vector<32x1xbf16>, vector<8x1xf32> -> vector<8x1xf32>
      %c0_92 = arith.constant 0 : index
      %c0_93 = arith.constant 0 : index
      %247 = vector.load %arg6[%c0_92, %c0_93] : memref<1x1xf32, #tpu.memory_space<vmem>>, vector<1x1xf32>
      %248 = vector.broadcast %247 : vector<1x1xf32> to vector<8x1xf32>
      %249 = arith.addf %246, %248 : vector<8x1xf32>
      %c0_94 = arith.constant 0 : index
      %c0_95 = arith.constant 0 : index
      %250 = vector.load %arg7[%c0_94, %c0_95] : memref<8x1xf32, #tpu.memory_space<vmem>>, vector<8x1xf32>
      tpu.vector_store %arg7[%c0_94, %c0_95], %249 {strides = array<i32>} : memref<8x1xf32, #tpu.memory_space<vmem>>, vector<8x1xf32>,
    } else {
    }
    return
  }
  func.func @transform_0(%arg0: i32) -> (i32, i32) {
    %c0_i32 = arith.constant 0 : i32
    %c0_i32_0 = arith.constant 0 : i32
    return %arg0, %c0_i32 : i32, i32
  }
  func.func @transform_1(%arg0: i32) -> (i32, i32) {
    %c0_i32 = arith.constant 0 : i32
    %c0_i32_0 = arith.constant 0 : i32
    %c0_i32_1 = arith.constant 0 : i32
    return %c0_i32, %c0_i32_0 : i32, i32
  }
  func.func @transform_2(%arg0: i32) -> (i32, i32) {
    %c0_i32 = arith.constant 0 : i32
    %c0_i32_0 = arith.constant 0 : i32
    %c0_i32_1 = arith.constant 0 : i32
    return %c0_i32, %c0_i32_0 : i32, i32
  }
  func.func @transform_3(%arg0: i32) -> (i32, i32) {
    %c0_i32 = arith.constant 0 : i32
    %c0_i32_0 = arith.constant 0 : i32
    %c0_i32_1 = arith.constant 0 : i32
    return %c0_i32, %c0_i32_0 : i32, i32
  }
  func.func @transform_4(%arg0: i32) -> (i32, i32) {
    %c0_i32 = arith.constant 0 : i32
    %c0_i32_0 = arith.constant 0 : i32
    %c0_i32_1 = arith.constant 0 : i32
    return %c0_i32, %c0_i32_0 : i32, i32
  }
  func.func @transform_5(%arg0: i32) -> (i32, i32) {
    %c0_i32 = arith.constant 0 : i32
    %c0_i32_0 = arith.constant 0 : i32
    %c0_i32_1 = arith.constant 0 : i32
    return %c0_i32, %c0_i32_0 : i32, i32
  }
  func.func @transform_6(%arg0: i32) -> (i32, i32) {
    %c0_i32 = arith.constant 0 : i32
    %c0_i32_0 = arith.constant 0 : i32
    %c0_i32_1 = arith.constant 0 : i32
    return %c0_i32, %c0_i32_0 : i32, i32
  }
}

</mosaic_0001>

<bundles_post_ra>
// kernel: lstm_model_forward.1
= control target key start
LH: loop header
LB: loop body
LE: loop exit
PB: predicated region body
PF: predicated region fallthrough
CT: control target
= control target key end

     0   :  { %vm30_vm0 = vcmask 261120   ;;  %v933_v0 = vmov 0.0   ;;  %vm934_vm1 = vmmov 0   ;;  %v935_v2 = vmov 0   ;;  %s937_s30 = smov 64   ;;  %s938_s8 = smov 32   ;;  %s1137_s2 = inlined_call_operand.vmem [shape: bf16[32,128], index: 2, kind: input, shape index: {}]   ;;  %s1138_s0 = inlined_call_operand.vmem [shape: f32[64,1], index: 0, kind: input, shape index: {}]   ;;  %s1139_s1 = inlined_call_operand.vmem [shape: f32[1,128], index: 1, kind: input, shape index: {}]   ;;  %s1140_s3 = inlined_call_operand.vmem [shape: f32[1,128], index: 3, kind: input, shape index: {}]   ;;  %s1141_s4 = inlined_call_operand.vmem [shape: bf16[32,1], index: 4, kind: input, shape index: {}]   ;;  %s1142_s5 = inlined_call_operand.<no memory space> [shape: f32[1,1], index: 5, kind: input, shape index: {}]   ;;  %s1143_s6 = inlined_call_operand.vmem [shape: f32[8,1], index: 6, kind: output, shape index: {}]  }
   0x1   :  { %802 = vmatprep.subr.bf16.mxu0 %v933_v0  ;;  %v978_v1 = vld [vmem:[%s1137_s2 + $0x8] sm:$0xff]   ;;  %806 = vmatprep.mubr.msk.bf16.mxu0 %vm934_vm1, %v933_v0  ;;  %31 = vst.msk [vmem:[#allocation2] sm:$0xff] %vm30_vm0, %v933_v0  ;;  %32 = vst.msk [vmem:[#allocation3] sm:$0xff] %vm30_vm0, %v933_v0  ;;  %v991_v3 = vld [vmem:[%s1137_s2] sm:$0xff]   ;;  %vm737_vm2 = vcmask 7168  }
   0x2   :  { %880 = vset.pattern.permute.xlu0 %v935_v2  ;;  %810 = vmatprep.subr.bf16.mxu1 %v933_v0  ;;  %v33_v4 = vld [vmem:[%s1138_s0] sm:$0xff]  ;;  %v34_v21 = vld [vmem:[%s1138_s0 + $0x8] sm:$0xff]  ;;  %v35_v46 = vld [vmem:[%s1138_s0 + $0x10] sm:$0xff] }
   0x3   :  { %803 = vmatpush3.bf16.msra.mxu0 %v978_v1  ;;  %811 = vmatpush3.bf16.msra.mxu1 %v978_v1  ;;  %v1015_v7 = vld [vmem:[%s1139_s1] ss:$0 sm:$0xff]  ;;  %s936_s1 = smov 96  }
   0x4   :  { %804 = vmatprep.subr.bf16.mxu0 %v933_v0  ;;  %44 = vperm.xlu0 %880, %v33_v4   ;;  %v1021_v10 = vld [vmem:[%s1140_s3] ss:$0 sm:$0xff] }
   0x5   :  { %812 = vmatprep.subr.bf16.mxu1 %v933_v0  ;;  %814 = vmatprep.mubr.msk.bf16.mxu1 %vm934_vm1, %v933_v0 }
   0x7   :  { %805 = vmatpush3.bf16.msra.mxu0 %v991_v3  ;;  %813 = vmatpush3.bf16.msra.mxu1 %v991_v3 }
   0x8   :  { %v123_v5 = vld [vmem:[#allocation2] sm:$0xff]  ;;  %818 = vmatprep.subr.bf16.mxu0 %v933_v0  ;;  %826 = vmatprep.subr.bf16.mxu1 %v933_v0  ;;  %v124_v24 = vld [vmem:[#allocation3] sm:$0xff] }
   0x9   :  { %v126_v6 = vpack.c.bf16 %v123_v5, %v123_v5 }
   0xb   :  { %807 = vmatmul.mubr.msk.bf16.vlgmr.msra.gmra.mxu0 %vm30_vm0, %v126_v6 }
   0xc   :  { %819 = vmatpush3.bf16.msra.mxu0 %v978_v1  ;;  %822 = vmatprep.mubr.msk.bf16.mxu0 %vm934_vm1, %v933_v0 }
   0xd   :  { %820 = vmatprep.subr.bf16.mxu0 %v933_v0 }
  0x10   :  { %821 = vmatpush3.bf16.msra.mxu0 %v991_v3 }
  0x11   :  { %834 = vmatprep.subr.bf16.mxu0 %v933_v0 }
  0x7f   :  { %v45_v8 = vpop.permute.xlu0 %44 }
  0x80   :  { %v88_v9 = vmul.f32 %v1015_v7, %v45_v8 }
  0x82   :  { %v103_v11 = vadd.f32 %v1021_v10, %v88_v9 }
  0xcb   :  { %v177_v12 = vpop.f32.mrf.mxu0 }
  0xcc   :  { %v183_v13 = vadd.f32 %v177_v12, %v103_v11  ;;  %v36_v11 = vld [vmem:[%s1138_s0 + $0x18] sm:$0xff] }
  0xcd   :  { %v808_v14 = vpop.f32.mrf.mxu0 }
  0xce   :  { %v748_v15 = vmul.f32 -1.442695, %v183_v13 }
  0xcf   :  { %v180_v16 = vpop.f32.mrf.mxu0 }
  0xd0   :  { %885 = vpow2.f32 %v748_v15 }
  0xd1   :  { %v809_v17 = vpop.f32.mrf.mxu0 }
  0xdd   :  { %v886_v18 = vpop.eup %885 }
  0xde   :  { %v187_v19 = vadd.f32 1.0, %v886_v18 }
  0xe0   :  { %887 = vrcp.f32 %v187_v19 }
  0xed   :  { %v888_v20 = vpop.eup %887 }
  0xee   :  { %190 = vrot.lane.b32.xlu1 %v888_v20, %s936_s1  ;;  %192 = vrot.lane.b32.xlu0 %v888_v20, %s937_s30 }
  0xf2   :  { %194 = vrot.lane.b32.xlu1 %v888_v20, %s938_s8  ;;  %49 = vperm.xlu0 %880, %v34_v21  }
 0x160   :  { %v193_v22 = vpop.permute.xlu0 %192  ;;  %v191_v25 = vpop.permute.xlu1 %190 }
 0x161   :  { %v196_v23 = vmul.f32 2.0, %v193_v22  ;;  %v198_v27 = vmul.f32 %v191_v25, %v124_v24 }
 0x163   :  { %v749_v26 = vadd.f32 -1.0, %v196_v23 }
 0x164   :  { %v195_v31 = vpop.permute.xlu1 %194 }
 0x165   :  { %v199_v28 = vmul.f32 %v888_v20, %v749_v26 }
 0x167   :  { %v200_v29 = vadd.f32 %v199_v28, %v198_v27 }
 0x169   :  { %889 = vtanh.f32 %v200_v29 }
 0x16d   :  { %v50_v34 = vpop.permute.xlu0 %49 }
 0x16e   :  { %v89_v35 = vmul.f32 %v1015_v7, %v50_v34 }
 0x170   :  { %v104_v36 = vadd.f32 %v1021_v10, %v89_v35  ;;  %v37_v35 = vld [vmem:[%s1138_s0 + $0x20] sm:$0xff] }
 0x176   :  { %v890_v30 = vpop.eup %889 }
 0x177   :  { %v202_v32 = vmul.f32 %v890_v30, %v195_v31 }
 0x179   :  { %v205_v33 = vpack.c.bf16 %v202_v32, %v202_v32 }
 0x17b   :  { %815 = vmatmul.mubr.msk.bf16.vlgmr.msra.gmra.mxu1 %vm30_vm0, %v205_v33 }
 0x17c   :  { %827 = vmatpush3.bf16.msra.mxu1 %v978_v1  ;;  %830 = vmatprep.mubr.msk.bf16.mxu1 %vm934_vm1, %v933_v0 }
 0x17d   :  { %828 = vmatprep.subr.bf16.mxu1 %v933_v0 }
 0x180   :  { %829 = vmatpush3.bf16.msra.mxu1 %v991_v3 }
 0x181   :  { %842 = vmatprep.subr.bf16.mxu1 %v933_v0 }
 0x23b   :  { %v243_v37 = vpop.f32.mrf.mxu1 }
 0x23c   :  { %v249_v38 = vadd.f32 %v243_v37, %v104_v36 }
 0x23d   :  { %v816_v39 = vpop.f32.mrf.mxu1 }
 0x23e   :  { %v751_v40 = vmul.f32 -1.442695, %v249_v38 }
 0x23f   :  { %v246_v41 = vpop.f32.mrf.mxu1 }
 0x240   :  { %891 = vpow2.f32 %v751_v40 }
 0x241   :  { %v817_v42 = vpop.f32.mrf.mxu1 }
 0x24d   :  { %v892_v43 = vpop.eup %891 }
 0x24e   :  { %v253_v44 = vadd.f32 1.0, %v892_v43 }
 0x250   :  { %893 = vrcp.f32 %v253_v44 }
 0x25d   :  { %v894_v45 = vpop.eup %893 }
 0x25e   :  { %256 = vrot.lane.b32.xlu0 %v894_v45, %s936_s1  ;;  %258 = vrot.lane.b32.xlu1 %v894_v45, %s937_s30 }
 0x262   :  { %54 = vperm.xlu0 %880, %v35_v46   ;;  %260 = vrot.lane.b32.xlu1 %v894_v45, %s938_s8 }
 0x2d0   :  { %v259_v47 = vpop.permute.xlu1 %258  ;;  %v257_v49 = vpop.permute.xlu0 %256 }
 0x2d1   :  { %v262_v48 = vmul.f32 2.0, %v259_v47  ;;  %v264_v51 = vmul.f32 %v257_v49, %v200_v29 }
 0x2d3   :  { %v752_v50 = vadd.f32 -1.0, %v262_v48 }
 0x2d4   :  { %v261_v55 = vpop.permute.xlu1 %260 }
 0x2d5   :  { %v265_v52 = vmul.f32 %v894_v45, %v752_v50 }
 0x2d7   :  { %v266_v53 = vadd.f32 %v265_v52, %v264_v51 }
 0x2d9   :  { %895 = vtanh.f32 %v266_v53 }
 0x2dd   :  { %v55_v58 = vpop.permute.xlu0 %54 }
 0x2de   :  { %v90_v59 = vmul.f32 %v1015_v7, %v55_v58 }
 0x2e0   :  { %v105_v60 = vadd.f32 %v1021_v10, %v90_v59  ;;  %v38_v59 = vld [vmem:[%s1138_s0 + $0x28] sm:$0xff] }
 0x2e6   :  { %v896_v54 = vpop.eup %895 }
 0x2e7   :  { %v268_v56 = vmul.f32 %v896_v54, %v261_v55 }
 0x2e9   :  { %v271_v57 = vpack.c.bf16 %v268_v56, %v268_v56 }
 0x2eb   :  { %823 = vmatmul.mubr.msk.bf16.vlgmr.msra.gmra.mxu0 %vm30_vm0, %v271_v57 }
 0x2ec   :  { %835 = vmatpush3.bf16.msra.mxu0 %v978_v1  ;;  %838 = vmatprep.mubr.msk.bf16.mxu0 %vm934_vm1, %v933_v0 }
 0x2ed   :  { %836 = vmatprep.subr.bf16.mxu0 %v933_v0 }
 0x2f0   :  { %837 = vmatpush3.bf16.msra.mxu0 %v991_v3 }
 0x2f1   :  { %850 = vmatprep.subr.bf16.mxu0 %v933_v0 }
 0x3ab   :  { %v309_v61 = vpop.f32.mrf.mxu0 }
 0x3ac   :  { %v315_v62 = vadd.f32 %v309_v61, %v105_v60 }
 0x3ad   :  { %v824_v63 = vpop.f32.mrf.mxu0 }
 0x3ae   :  { %v754_v2 = vmul.f32 -1.442695, %v315_v62 }
 0x3af   :  { %v312_v4 = vpop.f32.mrf.mxu0 }
 0x3b0   :  { %897 = vpow2.f32 %v754_v2 }
 0x3b1   :  { %v825_v5 = vpop.f32.mrf.mxu0 }
 0x3bd   :  { %v898_v6 = vpop.eup %897 }
 0x3be   :  { %v319_v8 = vadd.f32 1.0, %v898_v6 }
 0x3c0   :  { %899 = vrcp.f32 %v319_v8 }
 0x3cd   :  { %v900_v9 = vpop.eup %899 }
 0x3ce   :  { %322 = vrot.lane.b32.xlu0 %v900_v9, %s936_s1  ;;  %324 = vrot.lane.b32.xlu1 %v900_v9, %s937_s30 }
 0x3d2   :  { %59 = vperm.xlu0 %880, %v36_v11   ;;  %326 = vrot.lane.b32.xlu1 %v900_v9, %s938_s8 }
 0x440   :  { %v325_v12 = vpop.permute.xlu1 %324  ;;  %v323_v14 = vpop.permute.xlu0 %322 }
 0x441   :  { %v328_v13 = vmul.f32 2.0, %v325_v12  ;;  %v330_v16 = vmul.f32 %v323_v14, %v266_v53 }
 0x443   :  { %v755_v15 = vadd.f32 -1.0, %v328_v13 }
 0x444   :  { %v327_v20 = vpop.permute.xlu1 %326 }
 0x445   :  { %v331_v17 = vmul.f32 %v900_v9, %v755_v15 }
 0x447   :  { %v332_v18 = vadd.f32 %v331_v17, %v330_v16 }
 0x449   :  { %901 = vtanh.f32 %v332_v18 }
 0x44d   :  { %v60_v23 = vpop.permute.xlu0 %59 }
 0x44e   :  { %v91_v24 = vmul.f32 %v1015_v7, %v60_v23 }
 0x450   :  { %v106_v25 = vadd.f32 %v1021_v10, %v91_v24 }
 0x456   :  { %v902_v19 = vpop.eup %901 }
 0x457   :  { %v334_v21 = vmul.f32 %v902_v19, %v327_v20 }
 0x459   :  { %v337_v22 = vpack.c.bf16 %v334_v21, %v334_v21 }
 0x45b   :  { %831 = vmatmul.mubr.msk.bf16.vlgmr.msra.gmra.mxu1 %vm30_vm0, %v337_v22 }
 0x45c   :  { %843 = vmatpush3.bf16.msra.mxu1 %v978_v1  ;;  %846 = vmatprep.mubr.msk.bf16.mxu1 %vm934_vm1, %v933_v0 }
 0x45d   :  { %844 = vmatprep.subr.bf16.mxu1 %v933_v0 }
 0x460   :  { %845 = vmatpush3.bf16.msra.mxu1 %v991_v3 }
 0x461   :  { %858 = vmatprep.subr.bf16.mxu1 %v933_v0 }
 0x51b   :  { %v375_v26 = vpop.f32.mrf.mxu1 }
 0x51c   :  { %v381_v27 = vadd.f32 %v375_v26, %v106_v25 }
 0x51d   :  { %v832_v28 = vpop.f32.mrf.mxu1 }
 0x51e   :  { %v757_v29 = vmul.f32 -1.442695, %v381_v27 }
 0x51f   :  { %v378_v30 = vpop.f32.mrf.mxu1 }
 0x520   :  { %903 = vpow2.f32 %v757_v29 }
 0x521   :  { %v833_v31 = vpop.f32.mrf.mxu1 }
 0x52d   :  { %v904_v32 = vpop.eup %903 }
 0x52e   :  { %v385_v33 = vadd.f32 1.0, %v904_v32 }
 0x530   :  { %905 = vrcp.f32 %v385_v33 }
 0x53d   :  { %v906_v34 = vpop.eup %905 }
 0x53e   :  { %388 = vrot.lane.b32.xlu0 %v906_v34, %s936_s1  ;;  %390 = vrot.lane.b32.xlu1 %v906_v34, %s937_s30 }
 0x542   :  { %64 = vperm.xlu0 %880, %v37_v35   ;;  %392 = vrot.lane.b32.xlu1 %v906_v34, %s938_s8 }
 0x5b0   :  { %v391_v36 = vpop.permute.xlu1 %390  ;;  %v389_v38 = vpop.permute.xlu0 %388 }
 0x5b1   :  { %v394_v37 = vmul.f32 2.0, %v391_v36  ;;  %v396_v40 = vmul.f32 %v389_v38, %v332_v18 }
 0x5b3   :  { %v758_v39 = vadd.f32 -1.0, %v394_v37 }
 0x5b4   :  { %v393_v44 = vpop.permute.xlu1 %392 }
 0x5b5   :  { %v397_v41 = vmul.f32 %v906_v34, %v758_v39 }
 0x5b7   :  { %v398_v42 = vadd.f32 %v397_v41, %v396_v40 }
 0x5b9   :  { %907 = vtanh.f32 %v398_v42 }
 0x5bd   :  { %v65_v47 = vpop.permute.xlu0 %64 }
 0x5be   :  { %v92_v48 = vmul.f32 %v1015_v7, %v65_v47 }
 0x5c0   :  { %v107_v49 = vadd.f32 %v1021_v10, %v92_v48 }
 0x5c6   :  { %v908_v43 = vpop.eup %907 }
 0x5c7   :  { %v400_v45 = vmul.f32 %v908_v43, %v393_v44 }
 0x5c9   :  { %v403_v46 = vpack.c.bf16 %v400_v45, %v400_v45 }
 0x5cb   :  { %839 = vmatmul.mubr.msk.bf16.vlgmr.msra.gmra.mxu0 %vm30_vm0, %v403_v46  ;;  %v40_v46 = vld [vmem:[%s1138_s0 + $0x38] sm:$0xff] }
 0x5cc   :  { %851 = vmatpush3.bf16.msra.mxu0 %v978_v1  ;;  %854 = vmatprep.mubr.msk.bf16.mxu0 %vm934_vm1, %v933_v0 }
 0x5cd   :  { %852 = vmatprep.subr.bf16.mxu0 %v933_v0 }
 0x5d0   :  { %853 = vmatpush3.bf16.msra.mxu0 %v991_v3 }
 0x5d1   :  { %866 = vmatprep.subr.bf16.mxu0 %v933_v0 }
 0x68b   :  { %v441_v50 = vpop.f32.mrf.mxu0 }
 0x68c   :  { %v447_v51 = vadd.f32 %v441_v50, %v107_v49 }
 0x68d   :  { %v840_v52 = vpop.f32.mrf.mxu0 }
 0x68e   :  { %v760_v53 = vmul.f32 -1.442695, %v447_v51 }
 0x68f   :  { %v444_v54 = vpop.f32.mrf.mxu0 }
 0x690   :  { %909 = vpow2.f32 %v760_v53 }
 0x691   :  { %v841_v55 = vpop.f32.mrf.mxu0 }
 0x69d   :  { %v910_v56 = vpop.eup %909 }
 0x69e   :  { %v451_v57 = vadd.f32 1.0, %v910_v56 }
 0x6a0   :  { %911 = vrcp.f32 %v451_v57 }
 0x6ad   :  { %v912_v58 = vpop.eup %911 }
 0x6ae   :  { %454 = vrot.lane.b32.xlu0 %v912_v58, %s936_s1  ;;  %456 = vrot.lane.b32.xlu1 %v912_v58, %s937_s30 }
 0x6b2   :  { %69 = vperm.xlu0 %880, %v38_v59   ;;  %458 = vrot.lane.b32.xlu1 %v912_v58, %s938_s8 }
 0x720   :  { %v457_v60 = vpop.permute.xlu1 %456  ;;  %v455_v62 = vpop.permute.xlu0 %454 }
 0x721   :  { %v460_v61 = vmul.f32 2.0, %v457_v60  ;;  %v462_v2 = vmul.f32 %v455_v62, %v398_v42 }
 0x723   :  { %v761_v63 = vadd.f32 -1.0, %v460_v61 }
 0x724   :  { %v459_v8 = vpop.permute.xlu1 %458 }
 0x725   :  { %v463_v4 = vmul.f32 %v912_v58, %v761_v63 }
 0x727   :  { %v464_v5 = vadd.f32 %v463_v4, %v462_v2 }
 0x729   :  { %913 = vtanh.f32 %v464_v5 }
 0x72d   :  { %v70_v12 = vpop.permute.xlu0 %69 }
 0x72e   :  { %v93_v13 = vmul.f32 %v1015_v7, %v70_v12 }
 0x730   :  { %v108_v14 = vadd.f32 %v1021_v10, %v93_v13 }
 0x736   :  { %v914_v6 = vpop.eup %913 }
 0x737   :  { %v466_v9 = vmul.f32 %v914_v6, %v459_v8 }
 0x739   :  { %v469_v11 = vpack.c.bf16 %v466_v9, %v466_v9 }
 0x73b   :  { %847 = vmatmul.mubr.msk.bf16.vlgmr.msra.gmra.mxu1 %vm30_vm0, %v469_v11  ;;  %v11_v11 = vstv %s1142_s5 }
 0x73c   :  { %859 = vmatpush3.bf16.msra.mxu1 %v978_v1  ;;  %862 = vmatprep.mubr.msk.bf16.mxu1 %vm934_vm1, %v933_v0  ;;  %12 = vst [vmem:[#allocation5] sm:$0x1] %v11_v11 }
 0x73d   :  { %860 = vmatprep.subr.bf16.mxu1 %v933_v0 }
 0x740   :  { %861 = vmatpush3.bf16.msra.mxu1 %v991_v3  ;;  %v39_v3 = vld [vmem:[%s1138_s0 + $0x30] sm:$0xff] }
 0x7fb   :  { %v507_v15 = vpop.f32.mrf.mxu1 }
 0x7fc   :  { %v513_v16 = vadd.f32 %v507_v15, %v108_v14 }
 0x7fd   :  { %v848_v17 = vpop.f32.mrf.mxu1 }
 0x7fe   :  { %v763_v18 = vmul.f32 -1.442695, %v513_v16 }
 0x7ff   :  { %v510_v19 = vpop.f32.mrf.mxu1 }
 0x800   :  { %915 = vpow2.f32 %v763_v18 }
 0x801   :  { %v849_v20 = vpop.f32.mrf.mxu1 }
 0x80d   :  { %v916_v1 = vpop.eup %915 }
 0x80e   :  { %v517_v21 = vadd.f32 1.0, %v916_v1 }
 0x810   :  { %917 = vrcp.f32 %v517_v21  ;;  %v771_v21 = vld [vmem:[#allocation5] ss:$0 sm:$0xff] }
 0x81d   :  { %v918_v22 = vpop.eup %917 }
 0x81e   :  { %520 = vrot.lane.b32.xlu0 %v918_v22, %s936_s1  ;;  %522 = vrot.lane.b32.xlu1 %v918_v22, %s937_s30 }
 0x822   :  { %74 = vperm.xlu0 %880, %v39_v3   ;;  %524 = vrot.lane.b32.xlu1 %v918_v22, %s938_s8 }
 0x890   :  { %v523_v23 = vpop.permute.xlu1 %522  ;;  %v521_v25 = vpop.permute.xlu0 %520 }
 0x891   :  { %v526_v24 = vmul.f32 2.0, %v523_v23  ;;  %v528_v27 = vmul.f32 %v521_v25, %v464_v5 }
 0x893   :  { %v764_v26 = vadd.f32 -1.0, %v526_v24 }
 0x894   :  { %v525_v31 = vpop.permute.xlu1 %524 }
 0x895   :  { %v529_v28 = vmul.f32 %v918_v22, %v764_v26 }
 0x897   :  { %v530_v29 = vadd.f32 %v529_v28, %v528_v27 }
 0x899   :  { %919 = vtanh.f32 %v530_v29 }
 0x89d   :  { %v75_v34 = vpop.permute.xlu0 %74 }
 0x89e   :  { %v94_v35 = vmul.f32 %v1015_v7, %v75_v34 }
 0x8a0   :  { %v109_v36 = vadd.f32 %v1021_v10, %v94_v35 }
 0x8a6   :  { %v920_v30 = vpop.eup %919 }
 0x8a7   :  { %v532_v32 = vmul.f32 %v920_v30, %v525_v31 }
 0x8a9   :  { %v535_v33 = vpack.c.bf16 %v532_v32, %v532_v32 }
 0x8ab   :  { %855 = vmatmul.mubr.msk.bf16.vlgmr.msra.gmra.mxu0 %vm30_vm0, %v535_v33 }
 0x8ac   :  { %870 = vmatprep.mubr.msk.bf16.mxu0 %vm934_vm1, %v933_v0 }
 0x96b   :  { %v573_v37 = vpop.f32.mrf.mxu0 }
 0x96c   :  { %v579_v38 = vadd.f32 %v573_v37, %v109_v36 }
 0x96d   :  { %v856_v39 = vpop.f32.mrf.mxu0 }
 0x96e   :  { %v766_v40 = vmul.f32 -1.442695, %v579_v38 }
 0x96f   :  { %v576_v41 = vpop.f32.mrf.mxu0 }
 0x970   :  { %921 = vpow2.f32 %v766_v40 }
 0x971   :  { %v857_v42 = vpop.f32.mrf.mxu0 }
 0x97d   :  { %v922_v43 = vpop.eup %921 }
 0x97e   :  { %v583_v44 = vadd.f32 1.0, %v922_v43 }
 0x980   :  { %923 = vrcp.f32 %v583_v44 }
 0x98d   :  { %v924_v45 = vpop.eup %923 }
 0x98e   :  { %586 = vrot.lane.b32.xlu0 %v924_v45, %s936_s1  ;;  %588 = vrot.lane.b32.xlu1 %v924_v45, %s937_s30 }
 0x992   :  { %79 = vperm.xlu0 %880, %v40_v46   ;;  %590 = vrot.lane.b32.xlu1 %v924_v45, %s938_s8 }
 0xa00   :  { %v589_v47 = vpop.permute.xlu1 %588  ;;  %v587_v49 = vpop.permute.xlu0 %586 }
 0xa01   :  { %v592_v48 = vmul.f32 2.0, %v589_v47  ;;  %v594_v51 = vmul.f32 %v587_v49, %v530_v29 }
 0xa03   :  { %v767_v50 = vadd.f32 -1.0, %v592_v48 }
 0xa04   :  { %v591_v55 = vpop.permute.xlu1 %590 }
 0xa05   :  { %v595_v52 = vmul.f32 %v924_v45, %v767_v50 }
 0xa07   :  { %v596_v53 = vadd.f32 %v595_v52, %v594_v51 }
 0xa09   :  { %925 = vtanh.f32 %v596_v53 }
 0xa0d   :  { %v80_v58 = vpop.permute.xlu0 %79 }
 0xa0e   :  { %v95_v59 = vmul.f32 %v1015_v7, %v80_v58  ;;  %v883_v7 = vld [vmem:[%s1141_s4 + $0x8] sm:$0xff]  }
 0xa0f   :  { %867 = vmatpush3.bf16.msra.mxu0 %v883_v7 }
 0xa10   :  { %v110_v60 = vadd.f32 %v1021_v10, %v95_v59  ;;  %868 = vmatprep.subr.bf16.mxu0 %v933_v0  ;;  %v884_v10 = vld [vmem:[%s1141_s4] sm:$0xff]  }
 0xa13   :  { %869 = vmatpush3.bf16.msra.mxu0 %v884_v10 }
 0xa16   :  { %v926_v54 = vpop.eup %925 }
 0xa17   :  { %v598_v56 = vmul.f32 %v926_v54, %v591_v55 }
 0xa19   :  { %v601_v57 = vpack.c.bf16 %v598_v56, %v598_v56 }
 0xa1b   :  { %863 = vmatmul.mubr.msk.bf16.vlgmr.msra.gmra.mxu1 %vm30_vm0, %v601_v57 }
 0xadb   :  { %v639_v61 = vpop.f32.mrf.mxu1 }
 0xadc   :  { %v645_v62 = vadd.f32 %v639_v61, %v110_v60 }
 0xadd   :  { %v864_v63 = vpop.f32.mrf.mxu1 }
 0xade   :  { %v769_v2 = vmul.f32 -1.442695, %v645_v62 }
 0xadf   :  { %v642_v4 = vpop.f32.mrf.mxu1 }
 0xae0   :  { %927 = vpow2.f32 %v769_v2 }
 0xae1   :  { %v865_v5 = vpop.f32.mrf.mxu1 }
 0xaed   :  { %v928_v6 = vpop.eup %927 }
 0xaee   :  { %v649_v8 = vadd.f32 1.0, %v928_v6 }
 0xaf0   :  { %929 = vrcp.f32 %v649_v8 }
 0xafd   :  { %v930_v9 = vpop.eup %929 }
 0xafe   :  { %652 = vrot.lane.b32.xlu0 %v930_v9, %s936_s1  ;;  %654 = vrot.lane.b32.xlu1 %v930_v9, %s937_s30 }
 0xb02   :  { %656 = vrot.lane.b32.xlu1 %v930_v9, %s938_s8 }
 0xb70   :  { %v655_v12 = vpop.permute.xlu1 %654  ;;  %v653_v14 = vpop.permute.xlu0 %652 }
 0xb71   :  { %v658_v13 = vmul.f32 2.0, %v655_v12  ;;  %v660_v16 = vmul.f32 %v653_v14, %v596_v53 }
 0xb73   :  { %v770_v15 = vadd.f32 -1.0, %v658_v13 }
 0xb74   :  { %v657_v19 = vpop.permute.xlu1 %656 }
 0xb75   :  { %v661_v17 = vmul.f32 %v930_v9, %v770_v15 }
 0xb77   :  { %v662_v18 = vadd.f32 %v661_v17, %v660_v16 }
 0xb79   :  { %931 = vtanh.f32 %v662_v18  ;;  %666 = vst.msk [vmem:[#allocation3] sm:$0xff] %vm30_vm0, %v662_v18 }
 0xb86   :  { %v932_v0 = vpop.eup %931 }
 0xb87   :  { %v664_v20 = vmul.f32 %v932_v0, %v657_v19 }
 0xb89   :  { %665 = vst.msk [vmem:[#allocation2] sm:$0xff] %vm30_vm0, %v664_v20  ;;  %v670_v1 = vpack.c.bf16 %v664_v20, %v664_v20 }
 0xb8b   :  { %871 = vmatmul.mubr.msk.bf16.vlgmr.msra.gmra.mxu0 %vm30_vm0, %v670_v1 }
 0xc4b   :  { %v731_v22 = vpop.f32.mrf.mxu0 }
 0xc4c   :  { %v732_v3 = vadd.f32 %v771_v21, %v731_v22 }
 0xc4d   :  { %v872_v23 = vpop.f32.mrf.mxu0 }
 0xc4e   :  { %738 = vst.msk [vmem:[%s1143_s6] sm:$0xff] %vm737_vm2, %v732_v3 }
 0xc4f   :  { %v734_v24 = vpop.f32.mrf.mxu0 }
 0xc51   :  { %v873_v25 = vpop.f32.mrf.mxu0 }

</bundles_post_ra>
